<compile_context>
chip_gen: v7x
topology: tpu7x:2x2x1
jax: 0.10.0
libtpu: 0.0.40
codegen_flags: <defaults>
</compile_context>

<pallas_src>
import math
from functools import partial

import jax
import jax.numpy as jnp
from jax import lax
from jax.experimental import pallas as pl
from jax.experimental.pallas import tpu as pltpu


def _axial_rope_kernel(coef_ref, tmat_ref, ysin_ref, ycos_ref, sin_ref, cos_ref,
                       *, step_h):
    # coef_ref: (1, hd) f32      per-x-channel frequency * pi
    # tmat_ref: (hd, wd) f32     0/1 "tile across w" scatter matrix
    # ysin_ref/ycos_ref: (1, wd) f32  per-column tables (zeros in x slots)
    # sin_ref/cos_ref:  (th, wd) out dtype
    th = sin_ref.shape[0]
    hd = coef_ref.shape[1]

    # Tiny prologue: x-axis angles for the th rows of this tile, (th, hd).
    base = pl.program_id(0) * th
    row = lax.broadcasted_iota(jnp.int32, (th, hd), 0) + base
    pos_h = row.astype(jnp.float32) * step_h - 1.0       # linspace(-1, 1, h)
    ang_x = pos_h * coef_ref[...]                        # (th, hd)
    xs = jnp.sin(ang_x)
    xc = jnp.cos(ang_x)

    # Broadcast the (th, hd) x tables across the w column blocks via MXU and
    # add the (1, wd) y tables (sublane broadcast).  Store lane-dense.
    tm = tmat_ref[...]
    sin_full = jnp.dot(xs, tm, preferred_element_type=jnp.float32) + ysin_ref[...]
    cos_full = jnp.dot(xc, tm, preferred_element_type=jnp.float32) + ycos_ref[...]
    sin_ref[...] = sin_full.astype(sin_ref.dtype)
    cos_ref[...] = cos_full.astype(cos_ref.dtype)


@jax.jit
def axial_rotary_embedding(x: jax.Array, scales: jax.Array):
    """Pallas equivalent of AxialRotaryEmbedding.forward.

    x:      (..., H, W)  -- only trailing two dims and dtype used (NCHW input).
    scales: (dim // 4,)  -- the registered buffer from __init__.
    Returns (sin, cos), each of shape (1, H, W, dim), dtype x.dtype.
    """
    dim4 = scales.shape[0]
    dim = dim4 * 4
    hd = dim // 2
    h, w = int(x.shape[-2]), int(x.shape[-1])
    wd = w * dim
    out_dtype = x.dtype

    # --- tiny precompute (glue, not the hot path) --------------------------
    # Per-output-channel scale (channel c -> scales[c // 2]), with pi folded in.
    scales_rep2 = jnp.repeat(scales.astype(jnp.float32), 2)          # (hd,)
    coef = (scales_rep2 * math.pi).reshape(1, hd)

    # y-axis (per-column) sin/cos tables, flattened into one lane-dense row of
    # length w*dim with zeros in the x-half channel slots.
    pos_w = jnp.linspace(-1.0, 1.0, w, dtype=jnp.float32).reshape(w, 1)
    ang_y = pos_w * coef                                             # (w, hd)
    zeros = jnp.zeros((w, hd), jnp.float32)
    ysin = jnp.concatenate([zeros, jnp.sin(ang_y)], axis=-1).reshape(1, wd)
    ycos = jnp.concatenate([zeros, jnp.cos(ang_y)], axis=-1).reshape(1, wd)

    # Constant tiling matrix: T[c, j*dim + c] = 1 for x-half channels c < hd.
    lane_c = jnp.arange(wd, dtype=jnp.int32) % dim
    tmat = (jnp.arange(hd, dtype=jnp.int32)[:, None] == lane_c[None, :]
            ).astype(jnp.float32)                                    # (hd, wd)

    # --- row-tile size ------------------------------------------------------
    itemsize = jnp.dtype(out_dtype).itemsize
    sub = 16 if itemsize < 4 else 8            # bf16 packing wants 16 sublanes
    row_bytes_f32 = wd * 4
    max_rows = max(sub, ((2 << 20) // row_bytes_f32) // sub * sub)
    if h <= sub:
        th = h                                 # block == full dim -> legal
    else:
        th = min((h // sub) * sub, max_rows)
        while th > sub and h % th != 0:        # prefer tiles that divide h
            th -= sub
    num_blocks = pl.cdiv(h, th)

    # VMEM budget: 2 outs x 2 pipeline buffers + f32 temps + resident consts.
    tile_out_bytes = th * wd * itemsize
    tile_f32_bytes = th * wd * 4
    const_bytes = (hd * wd + 2 * wd + hd) * 4
    est = 4 * tile_out_bytes + 2 * const_bytes + 4 * tile_f32_bytes + (4 << 20)
    vmem_limit = int(min(max(est, 16 << 20), 32 << 20))

    step_h = 2.0 / (h - 1) if h > 1 else 0.0

    sin2d, cos2d = pl.pallas_call(
        partial(_axial_rope_kernel, step_h=step_h),
        grid=(num_blocks,),
        out_shape=(
            jax.ShapeDtypeStruct((h, wd), out_dtype),
            jax.ShapeDtypeStruct((h, wd), out_dtype),
        ),
        in_specs=[
            pl.BlockSpec((1, hd), lambda i: (0, 0)),     # coef
            pl.BlockSpec((hd, wd), lambda i: (0, 0)),    # tiling matrix
            pl.BlockSpec((1, wd), lambda i: (0, 0)),     # y sin row
            pl.BlockSpec((1, wd), lambda i: (0, 0)),     # y cos row
        ],
        out_specs=(
            pl.BlockSpec((th, wd), lambda i: (i, 0)),
            pl.BlockSpec((th, wd), lambda i: (i, 0)),
        ),
        compiler_params=pltpu.CompilerParams(
            dimension_semantics=("parallel",),
            vmem_limit_bytes=vmem_limit,
        ),
    )(coef, tmat, ysin, ycos)

    # '() i j (d r)' layout: free reshape of the contiguous (h, w*dim) slabs.
    sin = sin2d.reshape(1, h, w, dim)
    cos = cos2d.reshape(1, h, w, dim)
    return sin, cos


def _reference(x, scales):
    """Pure-JAX reference mirroring the PyTorch forward."""
    dim4 = scales.shape[0]
    h, w = x.shape[-2], x.shape[-1]
    dt = x.dtype
    seq_x = jnp.linspace(-1.0, 1.0, h, dtype=dt)[:, None]          # (h, 1)
    seq_y = jnp.linspace(-1.0, 1.0, w, dtype=dt)[:, None]          # (w, 1)
    sc = scales.astype(dt)[None, :]                                # (1, dim//4)
    seq_x = seq_x * sc * math.pi                                   # (h, dim//4)
    seq_y = seq_y * sc * math.pi                                   # (w, dim//4)
    x_sinu = jnp.broadcast_to(seq_x[:, None, :], (h, w, dim4))
    y_sinu = jnp.broadcast_to(seq_y[None, :, :], (h, w, dim4))
    sin = jnp.concatenate([jnp.sin(x_sinu), jnp.sin(y_sinu)], axis=-1)
    cos = jnp.concatenate([jnp.cos(x_sinu), jnp.cos(y_sinu)], axis=-1)
    # repeat 'i j d -> () i j (d r)', r=2
    sin = jnp.repeat(sin, 2, axis=-1)[None]
    cos = jnp.repeat(cos, 2, axis=-1)[None]
    return sin, cos


if __name__ == "__main__":
    # Module config: dim=32, max_freq=10 -> scales = linspace(1.0, 5.0, 8)
    dim = 32
    max_freq = 10
    scales = jnp.linspace(1.0, max_freq / 2.0, dim // 4, dtype=jnp.float32)

    # Example input (NCHW); values irrelevant, only (H, W) and dtype are used.
    key = jax.random.PRNGKey(0)
    x = jax.random.normal(key, (2, 4, 16, 16), dtype=jnp.float32)

    sin, cos = axial_rotary_embedding(x, scales)
    sin, cos = jax.block_until_ready((sin, cos))

    sin_ref, cos_ref = _reference(x, scales)
    assert sin.shape == (1, 16, 16, dim) and cos.shape == (1, 16, 16, dim)
    assert sin.dtype == x.dtype and cos.dtype == x.dtype
    assert jnp.allclose(sin, sin_ref, atol=1e-5, rtol=1e-5)
    assert jnp.allclose(cos, cos_ref, atol=1e-5, rtol=1e-5)

    print("KERNEL_OK")
</pallas_src>

<mosaic_0001>
module attributes {stable_mosaic.version = 11 : i64} {
  func.func @_axial_rope_kernel(%arg0: i32, %arg1: memref<1x16xf32, #tpu.memory_space<vmem>>, %arg2: memref<16x512xf32, #tpu.memory_space<vmem>>, %arg3: memref<1x512xf32, #tpu.memory_space<vmem>>, %arg4: memref<1x512xf32, #tpu.memory_space<vmem>>, %arg5: memref<16x512xf32, #tpu.memory_space<vmem>>, %arg6: memref<16x512xf32, #tpu.memory_space<vmem>>) attributes {dimension_semantics = [#tpu.dimension_semantics<parallel>], iteration_bounds = array<i64: 1>, scalar_prefetch = 0 : i64, scratch_operands = 0 : i64, tpu.core_type = #tpu.core_type<tc>, window_params = [{pipeline_mode = #tpu.pipeline_mode<synchronous>, transform_indices = @transform_0, window_bounds = array<i64: 1, 16>}, {pipeline_mode = #tpu.pipeline_mode<synchronous>, transform_indices = @transform_1, window_bounds = array<i64: 16, 512>}, {pipeline_mode = #tpu.pipeline_mode<synchronous>, transform_indices = @transform_2, window_bounds = array<i64: 1, 512>}, {pipeline_mode = #tpu.pipeline_mode<synchronous>, transform_indices = @transform_3, window_bounds = array<i64: 1, 512>}, {transform_indices = @transform_4, window_bounds = array<i64: 16, 512>}, {transform_indices = @transform_5, window_bounds = array<i64: 16, 512>}]} {
    %c16_i32 = arith.constant 16 : i32
    %0 = arith.muli %arg0, %c16_i32 : i32
    %1 = tpu.iota {dimensions = array<i32: 0>} : vector<16x16xi32>
    %2 = vector.broadcast %0 : i32 to vector<16x16xi32>
    %3 = arith.addi %1, %2 : vector<16x16xi32>
    %4 = arith.sitofp %3 : vector<16x16xi32> to vector<16x16xf32>
    %cst = arith.constant 0.13333334 : f32
    %5 = vector.broadcast %cst : f32 to vector<16x16xf32>
    %6 = arith.mulf %4, %5 : vector<16x16xf32>
    %cst_0 = arith.constant 1.000000e+00 : f32
    %7 = vector.broadcast %cst_0 : f32 to vector<16x16xf32>
    %8 = arith.subf %6, %7 : vector<16x16xf32>
    %c0 = arith.constant 0 : index
    %c0_1 = arith.constant 0 : index
    %9 = vector.load %arg1[%c0, %c0_1] : memref<1x16xf32, #tpu.memory_space<vmem>>, vector<1x16xf32>
    %10 = vector.broadcast %9 : vector<1x16xf32> to vector<16x16xf32>
    %11 = arith.mulf %8, %10 : vector<16x16xf32>
    %12 = math.sin %11 : vector<16x16xf32>
    %13 = math.cos %11 : vector<16x16xf32>
    %c0_2 = arith.constant 0 : index
    %c0_3 = arith.constant 0 : index
    %14 = vector.load %arg2[%c0_2, %c0_3] : memref<16x512xf32, #tpu.memory_space<vmem>>, vector<16x512xf32>
    %cst_4 = arith.constant dense<0.000000e+00> : vector<16x512xf32>
    %15 = tpu.matmul %12, %14, %cst_4 {dimension_numbers = #tpu.dot_dimension_numbers<[1], [0], [0], [1], [0, 0, 1, 1], [], []>} : vector<16x16xf32>, vector<16x512xf32>, vector<16x512xf32> -> vector<16x512xf32>
    %c0_5 = arith.constant 0 : index
    %c0_6 = arith.constant 0 : index
    %16 = vector.load %arg3[%c0_5, %c0_6] : memref<1x512xf32, #tpu.memory_space<vmem>>, vector<1x512xf32>
    %17 = vector.broadcast %16 : vector<1x512xf32> to vector<16x512xf32>
    %18 = arith.addf %15, %17 : vector<16x512xf32>
    %cst_7 = arith.constant dense<0.000000e+00> : vector<16x512xf32>
    %19 = tpu.matmul %13, %14, %cst_7 {dimension_numbers = #tpu.dot_dimension_numbers<[1], [0], [0], [1], [0, 0, 1, 1], [], []>} : vector<16x16xf32>, vector<16x512xf32>, vector<16x512xf32> -> vector<16x512xf32>
    %c0_8 = arith.constant 0 : index
    %c0_9 = arith.constant 0 : index
    %20 = vector.load %arg4[%c0_8, %c0_9] : memref<1x512xf32, #tpu.memory_space<vmem>>, vector<1x512xf32>
    %21 = vector.broadcast %20 : vector<1x512xf32> to vector<16x512xf32>
    %22 = arith.addf %19, %21 : vector<16x512xf32>
    %c0_10 = arith.constant 0 : index
    %c0_11 = arith.constant 0 : index
    %23 = vector.load %arg5[%c0_10, %c0_11] : memref<16x512xf32, #tpu.memory_space<vmem>>, vector<16x512xf32>
    tpu.vector_store %arg5[%c0_10, %c0_11], %18 {strides = array<i32>} : memref<16x512xf32, #tpu.memory_space<vmem>>, vector<16x512xf32>,
    %c0_12 = arith.constant 0 : index
    %c0_13 = arith.constant 0 : index
    %24 = vector.load %arg6[%c0_12, %c0_13] : memref<16x512xf32, #tpu.memory_space<vmem>>, vector<16x512xf32>
    tpu.vector_store %arg6[%c0_12, %c0_13], %22 {strides = array<i32>} : memref<16x512xf32, #tpu.memory_space<vmem>>, vector<16x512xf32>,
    return
  }
  func.func @transform_0(%arg0: i32) -> (i32, i32) {
    %c0_i32 = arith.constant 0 : i32
    %c0_i32_0 = arith.constant 0 : i32
    %c0_i32_1 = arith.constant 0 : i32
    return %c0_i32, %c0_i32_0 : i32, i32
  }
  func.func @transform_1(%arg0: i32) -> (i32, i32) {
    %c0_i32 = arith.constant 0 : i32
    %c0_i32_0 = arith.constant 0 : i32
    %c0_i32_1 = arith.constant 0 : i32
    return %c0_i32, %c0_i32_0 : i32, i32
  }
  func.func @transform_2(%arg0: i32) -> (i32, i32) {
    %c0_i32 = arith.constant 0 : i32
    %c0_i32_0 = arith.constant 0 : i32
    %c0_i32_1 = arith.constant 0 : i32
    return %c0_i32, %c0_i32_0 : i32, i32
  }
  func.func @transform_3(%arg0: i32) -> (i32, i32) {
    %c0_i32 = arith.constant 0 : i32
    %c0_i32_0 = arith.constant 0 : i32
    %c0_i32_1 = arith.constant 0 : i32
    return %c0_i32, %c0_i32_0 : i32, i32
  }
  func.func @transform_4(%arg0: i32) -> (i32, i32) {
    %c0_i32 = arith.constant 0 : i32
    %c0_i32_0 = arith.constant 0 : i32
    return %arg0, %c0_i32 : i32, i32
  }
  func.func @transform_5(%arg0: i32) -> (i32, i32) {
    %c0_i32 = arith.constant 0 : i32
    %c0_i32_0 = arith.constant 0 : i32
    return %arg0, %c0_i32 : i32, i32
  }
}

</mosaic_0001>

<bundles_post_ra>
// kernel: axial_rotary_embedding.1
= control target key start
LH: loop header
LB: loop body
LE: loop exit
PB: predicated region body
PF: predicated region fallthrough
CT: control target
= control target key end

     0   :  { %v20_v0 = vlaneseq  ;;  %v918_v4 = vmov 0.0   ;;  %v919_v44 = vmov 683565275   ;;  %v920_v46 = vmov 2475754826   ;;  %s1144_s1 = inlined_call_operand.vmem [shape: f32[16,512], index: 1, kind: input, shape index: {}]   ;;  %s1145_s0 = inlined_call_operand.vmem [shape: f32[1,16], index: 0, kind: input, shape index: {}]   ;;  %s1146_s2 = inlined_call_operand.vmem [shape: f32[1,512], index: 2, kind: input, shape index: {}]   ;;  %s1147_s4 = inlined_call_operand.vmem [shape: f32[16,512], index: 4, kind: output, shape index: {0}]   ;;  %s1148_s3 = inlined_call_operand.vmem [shape: f32[1,512], index: 3, kind: input, shape index: {}]   ;;  %s1149_s5 = inlined_call_operand.vmem [shape: f32[16,512], index: 5, kind: output, shape index: {1}]  }
   0x1   :  { %v456_v1 = vld [vmem:[%s1144_s1 + $0x8] sm:$0xff]  ;;  %v458_v3 = vld [vmem:[%s1144_s1 + $0x18] sm:$0xff]  ;;  %556 = vmatprep.mubr.f32.mxu0 %v918_v4  ;;  %633 = vmatprep.mubr.f32.mxu1 %v918_v4  ;;  %v455_v7 = vld [vmem:[%s1144_s1] sm:$0xff]  ;;  %v921_v48 = vmov 2131351028  }
   0x2   :  { %v460_v2 = vld [vmem:[%s1144_s1 + $0x28] sm:$0xff]  ;;  %v462_v6 = vld [vmem:[%s1144_s1 + $0x38] sm:$0xff]  ;;  %v459_v8 = vld [vmem:[%s1144_s1 + $0x20] sm:$0xff]  ;;  %v975_v9 = vshrl.u32 %v20_v0, 7  ;;  %v922_v50 = vmov 2102212464  }
   0x3   :  { %v879_v5 = vpack.c.bf16 %v460_v2, %v456_v1  ;;  %v883_v10 = vpack.c.bf16 %v462_v6, %v458_v3  ;;  %v977_v11 = vpack.c.bf16 %v459_v8, %v455_v7  ;;  %v457_v12 = vld [vmem:[%s1144_s1 + $0x10] sm:$0xff]  ;;  %v854_v19 = vld [vmem:[%s1145_s0] ss:$0 sm:$0xff]  ;;  %v923_v52 = vmov 920167782  }
   0x4   :  { %v461_v13 = vld [vmem:[%s1144_s1 + $0x30] sm:$0xff]  ;;  %v26_v15 = vcvt.s32.f32 %v975_v9  ;;  %v22_v16 = vadd.s32 8, %v975_v9  ;;  %v924_v59 = vmov 1326507024  }
   0x5   :  { %880 = vmatprep.subr.bf16.mxu0 %v879_v5  ;;  %v985_v14 = vpack.c.bf16 %v461_v13, %v457_v12  ;;  %884 = vmatprep.subr.bf16.mxu1 %v883_v10 }
   0x6   :  { %882 = vmatpush1.bf16.msra.mxu0 %v977_v11  ;;  %v28_v17 = vmul.f32 0.13333334, %v26_v15  ;;  %v27_v18 = vcvt.s32.f32 %v22_v16 }
   0x7   :  { %886 = vmatpush1.bf16.msra.mxu1 %v985_v14  ;;  %888 = vmatprep.subr.bf16.mxu0 %v879_v5 }
   0x8   :  { %892 = vmatprep.subr.bf16.mxu1 %v883_v10  ;;  %v852_v20 = vadd.f32 -1.0, %v28_v17  ;;  %v29_v21 = vmul.f32 0.13333334, %v27_v18 }
   0xa   :  { %v994_v22 = vmul.f32 %v854_v19, %v852_v20  ;;  %v853_v23 = vadd.f32 -1.0, %v29_v21 }
   0xc   :  { %v41_v24 = vand.u32 2147483647, %v994_v22  ;;  %v44_v25 = vand.u32 2139095040, %v994_v22  ;;  %v998_v26 = vmul.f32 %v854_v19, %v853_v23  ;;  %vm43_vm14 = vcmp.lt.s32.totalorder %v994_v22, 0 }
   0xe   :  { %v45_v27 = vshrl.u32 %v44_v25, 23  ;;  %v48_v28 = vand.u32 8388607, %v41_v24  ;;  %v145_v29 = vand.u32 2147483647, %v998_v26  ;;  %v148_v30 = vand.u32 2139095040, %v998_v26 }
   0xf   :  { %vm42_vm15 = vcmp.le.f32.partialorder %v41_v24, 0.7853982 }
  0x10   :  { %v855_v31 = vadd.s32 4294967169, %v45_v27  ;;  %v149_v32 = vshrl.u32 %v148_v30, 23  ;;  %v49_v34 = vor.u32 8388608, %v48_v28  ;;  %v1006_v36 = vand.u32 8388607, %v145_v29 }
  0x12   :  { %v51_v33 = vadd.s32 1, %v855_v31  ;;  %v859_v35 = vadd.s32 4294967169, %v149_v32  ;;  %v1008_v41 = vshll.u32 %v49_v34, 8  ;;  %v153_v42 = vor.u32 8388608, %v1006_v36 }
  0x14   :  { %vm52_vm0 = vcmp.gt.s32.totalorder %v51_v33, 0  ;;  %v155_v38 = vadd.s32 1, %v859_v35 }
  0x15   :  { %v53_v37 = vsel %vm52_vm0, %v51_v33, 0  ;;  %vm147_vm0 = vcmp.lt.s32.totalorder %v998_v26, 0 }
  0x16   :  { %v54_v39 = vshrl.u32 %v53_v37, 5  ;;  %v55_v40 = vand.u32 31, %v53_v37  ;;  %vm156_vm1 = vcmp.gt.s32.totalorder %v155_v38, 0 }
  0x17   :  { %v157_v0 = vsel %vm156_vm1, %v155_v38, 0  ;;  %vm146_vm1 = vcmp.le.f32.partialorder %v145_v29, 0.7853982 }
  0x18   :  { %v56_v43 = vsub.s32 32, %v55_v40  ;;  %v58_v45 = vshll.u32 %v919_v44, %v55_v40  ;;  %v61_v47 = vshll.u32 %v920_v46, %v55_v40  ;;  %v64_v49 = vshll.u32 %v921_v48, %v55_v40 }
  0x19   :  { %v67_v51 = vshll.u32 %v922_v50, %v55_v40  ;;  %v70_v53 = vshll.u32 %v923_v52, %v55_v40  ;;  %vm73_vm2 = vcmp.lt.s32.totalorder %v54_v39, 1  ;;  %vm74_vm3 = vcmp.lt.s32.totalorder %v54_v39, 2 }
  0x1a   :  { %v57_v54 = vshrl.u32 %v919_v44, %v56_v43  ;;  %v59_v55 = vshrl.u32 %v920_v46, %v56_v43  ;;  %v62_v56 = vshrl.u32 %v921_v48, %v56_v43  ;;  %v65_v57 = vshrl.u32 %v922_v50, %v56_v43 }
  0x1b   :  { %v68_v58 = vshrl.u32 %v923_v52, %v56_v43  ;;  %v71_v60 = vshrl.u32 %v924_v59, %v56_v43  ;;  %vm75_vm4 = vcmp.lt.s32.totalorder %v54_v39, 3  ;;  %vm76_vm5 = vcmp.lt.s32.totalorder %v54_v39, 4 }
  0x1c   :  { %v60_v61 = vor.u32 %v59_v55, %v58_v45  ;;  %v63_v62 = vor.u32 %v62_v56, %v61_v47  ;;  %v66_v63 = vor.u32 %v65_v57, %v64_v49  ;;  %v158_v3 = vshrl.u32 %v157_v0, 5 }
  0x1d   :  { %v69_v1 = vor.u32 %v68_v58, %v67_v51  ;;  %v72_v2 = vor.u32 %v71_v60, %v70_v53  ;;  %v159_v5 = vand.u32 31, %v157_v0 }
  0x1e   :  { %v77_v6 = vsel %vm73_vm2, %v57_v54, %v60_v61  ;;  %v78_v7 = vsel %vm76_vm5, %v66_v63, 2102212464  ;;  %v81_v8 = vsel %vm73_vm2, %v60_v61, %v63_v62  ;;  %v85_v10 = vsel %vm73_vm2, %v63_v62, %v66_v63 }
  0x1f   :  { %v79_v12 = vsel %vm75_vm4, %v63_v62, %v78_v7  ;;  %v82_v13 = vsel %vm76_vm5, %v69_v1, 920167782  ;;  %v86_v15 = vsel %vm76_vm5, %v72_v2, 1326507024  ;;  %v160_v16 = vsub.s32 32, %v159_v5 }
  0x20   :  { %v80_v17 = vsel %vm74_vm3, %v77_v6, %v79_v12  ;;  %v83_v18 = vsel %vm75_vm4, %v66_v63, %v82_v13  ;;  %v87_v19 = vsel %vm75_vm4, %v69_v1, %v86_v15  ;;  %v162_v20 = vshll.u32 %v919_v44, %v159_v5 }
  0x21   :  { %v84_v21 = vsel %vm74_vm3, %v81_v8, %v83_v18  ;;  %v88_v23 = vsel %vm74_vm3, %v85_v10, %v87_v19  ;;  %v96_v25 = vmul.u32 %v1008_v41, %v80_v17  ;;  %v161_v27 = vshrl.u32 %v919_v44, %v160_v16 }
  0x22   :  { %v1023_v28 = vmul.u32.u64.low %v1008_v41, %v88_v23  ;;  %v1024_v30 = vmul.u32.u64.high %v1008_v41, %v88_v23, %v1023_v28  ;;  %v1027_v31 = vmul.u32.u64.low %v1008_v41, %v84_v21  ;;  %v1028_v32 = vmul.u32.u64.high %v1008_v41, %v84_v21, %v1027_v31 }
  0x23   :  { %v163_v33 = vshrl.u32 %v920_v46, %v160_v16  ;;  %v165_v34 = vshll.u32 %v920_v46, %v159_v5  ;;  %v166_v35 = vshrl.u32 %v921_v48, %v160_v16  ;;  %v168_v37 = vshll.u32 %v921_v48, %v159_v5 }
  0x24   :  { %v169_v38 = vshrl.u32 %v922_v50, %v160_v16  ;;  %v171_v40 = vshll.u32 %v922_v50, %v159_v5  ;;  %v172_v43 = vshrl.u32 %v923_v52, %v160_v16  ;;  %v174_v39 = vshll.u32 %v923_v52, %v159_v5 }
  0x25   :  { %v164_v45 = vor.u32 %v163_v33, %v162_v20  ;;  %v167_v47 = vor.u32 %v166_v35, %v165_v34  ;;  %v175_v49 = vshrl.u32 %v924_v59, %v160_v16  ;;  %vm177_vm6 = vcmp.lt.s32.totalorder %v158_v3, 1 }
  0x26   :  { %vm98_vm7 = vc.u32 %v1024_v30, %v1027_v31  ;;  %v99_v44 = vadd.s32 1, %v1028_v32  ;;  %v170_v51 = vor.u32 %v169_v38, %v168_v37  ;;  %v193_v41 = vshll.u32 %v153_v42, 8 }
  0x27   :  { %v173_v53 = vor.u32 %v172_v43, %v171_v40  ;;  %v176_v46 = vor.u32 %v175_v49, %v174_v39  ;;  %vm178_vm8 = vcmp.lt.s32.totalorder %v158_v3, 2  ;;  %vm179_vm9 = vcmp.lt.s32.totalorder %v158_v3, 3 }
  0x28   :  { %v100_v48 = vsel %vm98_vm7, %v99_v44, %v1028_v32  ;;  %vm180_vm10 = vcmp.lt.s32.totalorder %v158_v3, 4  ;;  %v181_v50 = vsel %vm177_vm6, %v161_v27, %v164_v45  ;;  %v185_v52 = vsel %vm177_vm6, %v164_v45, %v167_v47 }
  0x29   :  { %v101_v54 = vadd.s32 %v100_v48, %v96_v25  ;;  %v182_v55 = vsel %vm180_vm10, %v170_v51, 2102212464  ;;  %v186_v56 = vsel %vm180_vm10, %v173_v53, 920167782  ;;  %v189_v57 = vsel %vm177_vm6, %v167_v47, %v170_v51 }
  0x2a   :  { %v183_v58 = vsel %vm179_vm9, %v167_v47, %v182_v55  ;;  %v187_v59 = vsel %vm179_vm9, %v170_v51, %v186_v56  ;;  %v190_v36 = vsel %vm180_vm10, %v176_v46, 1326507024  ;;  %v97_v23 = vadd.s32 %v1027_v31, %v1024_v30 }
  0x2b   :  { %v102_v42 = vadd.s32 536870912, %v101_v54  ;;  %v188_v60 = vsel %vm178_vm8, %v185_v52, %v187_v59  ;;  %v191_v61 = vsel %vm179_vm9, %v173_v53, %v190_v36  ;;  %v184_v62 = vsel %vm178_vm8, %v181_v50, %v183_v58 }
  0x2c   :  { %v192_v63 = vsel %vm178_vm8, %v189_v57, %v191_v61  ;;  %v1041_v0 = vmul.u32.u64.low %v193_v41, %v188_v60  ;;  %v1042_v1 = vmul.u32.u64.high %v193_v41, %v188_v60, %v1041_v0  ;;  %v200_v8 = vmul.u32 %v193_v41, %v184_v62 }
  0x2d   :  { %v103_v2 = vshrl.u32 %v102_v42, 30  ;;  %v1044_v5 = vmul.u32.u64.low %v193_v41, %v192_v63  ;;  %v1045_v6 = vmul.u32.u64.high %v193_v41, %v192_v63, %v1044_v5  ;;  %vm133_vm5 = vweird.f32 %v994_v22 }
  0x2e   :  { %v203_v10 = vadd.s32 1, %v1042_v1  ;;  %vm485_vm6 = vcmask 130048  }
  0x2f   :  { %v104_v7 = vshll.u32 %v103_v2, 30  ;;  %vm202_vm11 = vc.u32 %v1045_v6, %v1041_v0  ;;  %v127_v51 = vsub.s32 4, %v103_v2  ;;  %v201_v30 = vadd.s32 %v1041_v0, %v1045_v6 }
  0x30   :  { %v204_v13 = vsel %vm202_vm11, %v203_v10, %v1042_v1 }
  0x31   :  { %v105_v12 = vsub.s32 %v101_v54, %v104_v7  ;;  %v205_v16 = vadd.s32 %v204_v13, %v200_v8  ;;  %v128_v52 = vsel %vm43_vm14, %v127_v51, %v103_v2 }
  0x32   :  { %v130_v58 = vsel %vm42_vm15, 0, %v128_v52 }
  0x33   :  { %v107_v15 = vsub.s32 0, %v105_v12  ;;  %v206_v17 = vadd.s32 536870912, %v205_v16  ;;  %v134_v61 = vadd.s32 3, %v130_v58 }
  0x35   :  { %v856_v3 = vmin.u32 %v107_v15, %v105_v12  ;;  %v207_v19 = vshrl.u32 %v206_v17, 30  ;;  %v135_v1 = vand.u32 3, %v134_v61 }
  0x37   :  { %v109_v18 = vclz %v856_v3  ;;  %v208_v21 = vshll.u32 %v207_v19, 30  ;;  %v231_v63 = vsub.s32 4, %v207_v19  ;;  %vm140_vm2 = vcmp.eq.s32.totalorder %v135_v1, 2 }
  0x38   :  { %vm137_vm3 = vcmp.eq.s32.totalorder %v135_v1, 0  ;;  %vm136_vm4 = vcmp.lt.s32.totalorder %v135_v1, 2 }
  0x39   :  { %v857_v20 = vadd.s32 4294967294, %v109_v18  ;;  %v209_v27 = vsub.s32 %v205_v16, %v208_v21  ;;  %v232_v2 = vsel %vm147_vm0, %v231_v63, %v207_v19  ;;  %v342_v18 = vand.u32 3, %v130_v58 }
  0x3a   :  { %v234_v8 = vsel %vm146_vm1, 0, %v232_v2 }
  0x3b   :  { %vm858_vm12 = vcmp.lt.s32.totalorder %v857_v20, 0  ;;  %v211_v34 = vsub.s32 0, %v209_v27  ;;  %v238_v16 = vadd.s32 3, %v234_v8  ;;  %vm344_vm7 = vcmp.eq.s32.totalorder %v342_v18, 0 }
  0x3c   :  { %v112_v25 = vsel %vm858_vm12, 0, %v857_v20  ;;  %vm347_vm8 = vcmp.eq.s32.totalorder %v342_v18, 2  ;;  %v445_v20 = vand.u32 3, %v234_v8  ;;  %vm343_vm10 = vcmp.lt.s32.totalorder %v342_v18, 2 }
  0x3d   :  { %v113_v28 = vsub.s32 32, %v112_v25  ;;  %v114_v32 = vshll.u32 %v105_v12, %v112_v25  ;;  %v117_v33 = vsub.s32 4294967266, %v112_v25  ;;  %v860_v38 = vmin.u32 %v211_v34, %v209_v27 }
  0x3e   :  { %v239_v19 = vand.u32 3, %v238_v16 }
  0x3f   :  { %v115_v35 = vshrl.u32 %v97_v23, %v113_v28  ;;  %v118_v37 = vadd.s32 127, %v117_v33  ;;  %v213_v39 = vclz %v860_v38 }
  0x40   :  { %vm244_vm9 = vcmp.eq.s32.totalorder %v239_v19, 2  ;;  %vm241_vm11 = vcmp.eq.s32.totalorder %v239_v19, 0  ;;  %vm240_vm12 = vcmp.lt.s32.totalorder %v239_v19, 2 }
  0x41   :  { %v116_v40 = vor.u32 %v115_v35, %v114_v32  ;;  %v119_v43 = vshll.u32 %v118_v37, 23  ;;  %v861_v49 = vadd.s32 4294967294, %v213_v39 }
  0x43   :  { %v120_v45 = vor.u32 4788187, %v119_v43  ;;  %v123_v47 = vcvt.s32.f32 %v116_v40  ;;  %vm862_vm13 = vcmp.lt.s32.totalorder %v861_v49, 0 }
  0x44   :  { %v216_v41 = vsel %vm862_vm13, 0, %v861_v49  ;;  %vm237_vm13 = vweird.f32 %v998_v26  ;;  %v471_v49 = vsub.s32 1, %v975_v9 }
  0x45   :  { %v121_v44 = vand.u32 2147483647, %v120_v45  ;;  %v217_v53 = vsub.s32 32, %v216_v41  ;;  %v218_v46 = vshll.u32 %v209_v27, %v216_v41  ;;  %v221_v48 = vsub.s32 4294967266, %v216_v41 }
  0x46   :  { %v475_v45 = vsub.s32 2, %v975_v9 }
  0x47   :  { %v124_v31 = vmul.f32 %v123_v47, %v121_v44  ;;  %v219_v54 = vshrl.u32 %v201_v30, %v217_v53  ;;  %v222_v55 = vadd.s32 127, %v221_v48  ;;  %v463_v47 = vld [vmem:[%s1146_s2] sm:$0xf]  ;;  %v479_v44 = vsub.s32 3, %v975_v9 }
  0x48   :  { %v476_v51 = vrot.slane %v463_v47, %v475_v45 }
  0x49   :  { %v125_v50 = vxor.u32 2147483648, %v124_v31  ;;  %v220_v59 = vor.u32 %v219_v54, %v218_v46  ;;  %v223_v36 = vshll.u32 %v222_v55, 23  ;;  %v480_v30 = vrot.slane %v463_v47, %v479_v44 }
  0x4b   :  { %v126_v56 = vsel %vm43_vm14, %v125_v50, %v124_v31  ;;  %v224_v42 = vor.u32 4788187, %v223_v36  ;;  %v227_v60 = vcvt.s32.f32 %v220_v59  ;;  %vm447_vm14 = vcmp.eq.s32.totalorder %v445_v20, 0 }
  0x4c   :  { %v129_v57 = vsel %vm42_vm15, %v994_v22, %v126_v56  ;;  %vm450_vm15 = vcmp.eq.s32.totalorder %v445_v20, 2  ;;  %v467_v22 = vsub.s32 0, %v975_v9  ;;  %v646_v9 = vld [vmem:[%s1148_s3] sm:$0xf] }
  0x4d   :  { %910 = vcosq.f32 %v129_v57  ;;  %v225_v62 = vand.u32 2147483647, %v224_v42  ;;  %v655_v63 = vrot.slane %v646_v9, %v471_v49 }
  0x4e   :  { %912 = vsinq.f32 %v129_v57  ;;  %v651_v42 = vrot.slane %v646_v9, %v467_v22 }
  0x4f   :  { %v228_v0 = vmul.f32 %v227_v60, %v225_v62  ;;  %v659_v60 = vrot.slane %v646_v9, %v475_v45 }
  0x51   :  { %v229_v24 = vxor.u32 2147483648, %v228_v0 }
  0x53   :  { %v230_v5 = vsel %vm147_vm0, %v229_v24, %v228_v0  ;;  %vm446_vm0 = vcmp.lt.s32.totalorder %v445_v20, 2  ;;  %v663_v0 = vrot.slane %v646_v9, %v479_v44 }
  0x54   :  { %v233_v7 = vsel %vm146_vm1, %v998_v26, %v230_v5  ;;  %v472_v26 = vrot.slane %v463_v47, %v471_v49 }
  0x55   :  { %914 = vcosq.f32 %v233_v7 }
  0x56   :  { %916 = vsinq.f32 %v233_v7 }
  0x57   :  { %v911_v6 = vpop.eup %910 }
  0x58   :  { %v913_v10 = vpop.eup %912  ;;  %v141_v12 = vxor.u32 2147483648, %v911_v6 }
  0x59   :  { %v138_v13 = vxor.u32 2147483648, %v913_v10 }
  0x5a   :  { %v142_v15 = vsel %vm140_vm2, %v141_v12, %v913_v10  ;;  %v349_v28 = vsel %vm347_vm8, %v141_v12, %v913_v10 }
  0x5b   :  { %v139_v29 = vsel %vm137_vm3, %v911_v6, %v138_v13  ;;  %v346_v27 = vsel %vm344_vm7, %v911_v6, %v138_v13 }
  0x5c   :  { %v143_v3 = vsel %vm136_vm4, %v139_v29, %v142_v15  ;;  %v350_v33 = vsel %vm343_vm10, %v346_v27, %v349_v28 }
  0x5d   :  { %v144_v17 = vsel %vm133_vm5, nan, %v143_v3  ;;  %v351_v40 = vsel %vm133_vm5, nan, %v350_v33 }
  0x5e   :  { %871 = vmatmul.mubr.msk.f32.vlgmr.msra.gmra.mrb[0].mxu0 %vm485_vm6, %v144_v17  ;;  %873 = vmatmul.mubr.msk.f32.vlgmr.msra.gmra.mrb[0].mxu1 %vm485_vm6, %v144_v17 }
  0x5f   :  { %890 = vmatpush1.bf16.msra.mxu0 %v977_v11  ;;  %894 = vmatpush1.bf16.msra.mxu1 %v985_v14  ;;  %v915_v21 = vpop.eup %914 }
  0x60   :  { %562 = vmatprep.mubr.f32.mxu0 %v918_v4  ;;  %639 = vmatprep.mubr.f32.mxu1 %v918_v4  ;;  %v917_v23 = vpop.eup %916  ;;  %v245_v25 = vxor.u32 2147483648, %v915_v21 }
  0x61   :  { %v242_v32 = vxor.u32 2147483648, %v917_v23 }
  0x62   :  { %v246_v11 = vsel %vm244_vm9, %v245_v25, %v917_v23  ;;  %v452_v38 = vsel %vm450_vm15, %v245_v25, %v917_v23 }
  0x63   :  { %v243_v14 = vsel %vm241_vm11, %v915_v21, %v242_v32  ;;  %v449_v37 = vsel %vm447_vm14, %v915_v21, %v242_v32 }
  0x64   :  { %v247_v34 = vsel %vm240_vm12, %v243_v14, %v246_v11  ;;  %v453_v43 = vsel %vm446_vm0, %v449_v37, %v452_v38 }
  0x65   :  { %v248_v35 = vsel %vm237_vm13, nan, %v247_v34  ;;  %v454_v39 = vsel %vm237_vm13, nan, %v453_v43 }
  0x66   :  { %872 = vmatmul.mubr.msk.f32.gmra.mrb[2].mxu0 %vm485_vm6, %v248_v35  ;;  %874 = vmatmul.mubr.msk.f32.gmra.mrb[2].mxu1 %vm485_vm6, %v248_v35 }
  0x67   :  { %738 = vmatprep.mubr.f32.mxu0 %v918_v4  ;;  %815 = vmatprep.mubr.f32.mxu1 %v918_v4 }
  0x6a   :  { %875 = vmatmul.mubr.msk.f32.vlgmr.msra.gmra.mrb[4].mxu0 %vm485_vm6, %v351_v40  ;;  %877 = vmatmul.mubr.msk.f32.vlgmr.msra.gmra.mrb[4].mxu1 %vm485_vm6, %v351_v40 }
  0x6b   :  { %744 = vmatprep.mubr.f32.mxu0 %v918_v4  ;;  %821 = vmatprep.mubr.f32.mxu1 %v918_v4  ;;  %v468_v4 = vrot.slane %v463_v47, %v467_v22 }
  0x6e   :  { %876 = vmatmul.mubr.msk.f32.gmra.mrb[6].mxu0 %vm485_vm6, %v454_v39  ;;  %878 = vmatmul.mubr.msk.f32.gmra.mrb[6].mxu1 %vm485_vm6, %v454_v39 }
 0x131   :  { %v558_v31 = vpop.f32.mrb[0].mxu0  ;;  %v635_v41 = vpop.f32.mrb[0].mxu1 }
 0x132   :  { %v559_v53 = vadd.f32 %v558_v31, %v468_v4  ;;  %v636_v46 = vadd.f32 %v635_v41, %v476_v51  ;;  %v560_v48 = vpop.f32.mrb[1].mxu0  ;;  %v637_v50 = vpop.f32.mrb[1].mxu1 }
 0x133   :  { %v561_v52 = vadd.f32 %v560_v48, %v472_v26  ;;  %v638_v54 = vadd.f32 %v637_v50, %v480_v30 }
 0x134   :  { %828 = vst [vmem:[%s1147_s4] sm:$0xff] %v559_v53  ;;  %830 = vst [vmem:[%s1147_s4 + $0x10] sm:$0xff] %v636_v46 }
 0x135   :  { %829 = vst [vmem:[%s1147_s4 + $0x8] sm:$0xff] %v561_v52  ;;  %831 = vst [vmem:[%s1147_s4 + $0x18] sm:$0xff] %v638_v54 }
 0x139   :  { %v564_v55 = vpop.f32.mrb[2].mxu0  ;;  %v641_v56 = vpop.f32.mrb[2].mxu1 }
 0x13a   :  { %v565_v57 = vadd.f32 %v564_v55, %v468_v4  ;;  %v642_v58 = vadd.f32 %v641_v56, %v476_v51  ;;  %v566_v59 = vpop.f32.mrb[3].mxu0  ;;  %v643_v36 = vpop.f32.mrb[3].mxu1 }
 0x13b   :  { %v567_v61 = vadd.f32 %v566_v59, %v472_v26  ;;  %v644_v62 = vadd.f32 %v643_v36, %v480_v30 }
 0x13c   :  { %832 = vst [vmem:[%s1147_s4 + $0x20] sm:$0xff] %v565_v57  ;;  %834 = vst [vmem:[%s1147_s4 + $0x30] sm:$0xff] %v642_v58 }
 0x13d   :  { %833 = vst [vmem:[%s1147_s4 + $0x28] sm:$0xff] %v567_v61  ;;  %835 = vst [vmem:[%s1147_s4 + $0x38] sm:$0xff] %v644_v62  ;;  %v740_v1 = vpop.f32.mrb[4].mxu0  ;;  %v817_v24 = vpop.f32.mrb[4].mxu1 }
 0x13e   :  { %v741_v2 = vadd.f32 %v740_v1, %v651_v42  ;;  %v818_v5 = vadd.f32 %v817_v24, %v659_v60  ;;  %v742_v6 = vpop.f32.mrb[5].mxu0  ;;  %v819_v7 = vpop.f32.mrb[5].mxu1 }
 0x13f   :  { %v743_v8 = vadd.f32 %v742_v6, %v655_v63  ;;  %v820_v10 = vadd.f32 %v819_v7, %v663_v0 }
 0x140   :  { %836 = vst [vmem:[%s1149_s5] sm:$0xff] %v741_v2  ;;  %838 = vst [vmem:[%s1149_s5 + $0x10] sm:$0xff] %v818_v5 }
 0x141   :  { %837 = vst [vmem:[%s1149_s5 + $0x8] sm:$0xff] %v743_v8  ;;  %839 = vst [vmem:[%s1149_s5 + $0x18] sm:$0xff] %v820_v10  ;;  %v746_v12 = vpop.f32.mrb[6].mxu0  ;;  %v823_v13 = vpop.f32.mrb[6].mxu1 }
 0x142   :  { %v747_v15 = vadd.f32 %v746_v12, %v651_v42  ;;  %v824_v16 = vadd.f32 %v823_v13, %v659_v60  ;;  %v748_v29 = vpop.f32.mrb[7].mxu0  ;;  %v825_v3 = vpop.f32.mrb[7].mxu1 }
 0x143   :  { %v749_v17 = vadd.f32 %v748_v29, %v655_v63  ;;  %v826_v18 = vadd.f32 %v825_v3, %v663_v0 }
 0x144   :  { %840 = vst [vmem:[%s1149_s5 + $0x20] sm:$0xff] %v747_v15  ;;  %842 = vst [vmem:[%s1149_s5 + $0x30] sm:$0xff] %v824_v16 }
 0x145   :  { %841 = vst [vmem:[%s1149_s5 + $0x28] sm:$0xff] %v749_v17  ;;  %843 = vst [vmem:[%s1149_s5 + $0x38] sm:$0xff] %v826_v18 }

</bundles_post_ra>
